<compile_context>
chip_gen: v6e
topology: v6e:2x2x1
jax: 0.10.0
libtpu: 0.0.40
codegen_flags: <defaults>
</compile_context>

<pallas_src>
import jax
import jax.numpy as jnp
from jax.experimental import pallas as pl
from jax.experimental.pallas import tpu as pltpu


def _grouped_patch_embed_kernel(x_ref, w_ref, b_ref, o_ref):
    # x_ref: (1, TILE_M, K), w_ref: (1, K, E), b_ref: (1, 1, E), o_ref: (1, TILE_M, E)
    acc = jnp.dot(x_ref[0], w_ref[0], preferred_element_type=jnp.float32)
    o_ref[0] = (acc + b_ref[0]).astype(o_ref.dtype)


def grouped_hyperspectral_patch_embed(x, weight, bias, *, patch_size,
                                      bands_per_token, tile_m=512):
    """
    x:      (B, C, H, W)                      NCHW, like the PyTorch module
    weight: (E*G, bands_per_token, p, p)      grouped Conv2d weight
    bias:   (E*G,)
    returns (B, G * (H/p) * (W/p), E)  ==  Rearrange('b (l c) h w -> b (l h w) c')
    """
    B, C, H, W = x.shape
    p = patch_size
    if C % bands_per_token != 0:
        raise ValueError("in_channels must be divisible by bands_per_token.")
    G = C // bands_per_token
    E = weight.shape[0] // G
    Hp, Wp = H // p, W // p
    N = Hp * Wp
    K = bands_per_token * p * p
    M = B * N

    # --- Glue: patch extraction (B, C, H, W) -> (G, B*N, K), flatten order
    # (band, kh, kw) matching Conv2d's per-output-channel weight layout.
    xr = x.reshape(B, G, bands_per_token, Hp, p, Wp, p)
    patches = xr.transpose(1, 0, 3, 5, 2, 4, 6).reshape(G, M, K)

    # --- Glue: Conv2d weight (E*G, bands, p, p) -> (G, K, E); bias -> f32 (G, 1, E).
    wr = weight.reshape(G, E, K).transpose(0, 2, 1).astype(x.dtype)
    br = bias.reshape(G, 1, E).astype(jnp.float32)

    # --- M tiling: tall lane-dense matmul, tile multiple of 8 sublanes.
    tile_m = max(8, (tile_m // 8) * 8)
    TILE_M = tile_m if M >= tile_m else M          # full extent when M is small
    num_m = pl.cdiv(M, TILE_M)
    Mp = num_m * TILE_M
    if Mp != M:
        patches = jnp.pad(patches, ((0, 0), (0, Mp - M), (0, 0)))

    # Explicit VMEM budget (double-buffered in/out + resident per-group weight).
    isz = x.dtype.itemsize
    vmem_need = (2 * TILE_M * K * isz          # input tiles (double buffered)
                 + 2 * TILE_M * E * isz        # output tiles (double buffered)
                 + 2 * K * E * isz             # per-group weight
                 + 2 * E * 4)                  # per-group bias (f32)
    vmem_limit = int(min(max(2 * vmem_need, 16 << 20), 48 << 20))

    out = pl.pallas_call(
        _grouped_patch_embed_kernel,
        out_shape=jax.ShapeDtypeStruct((G, Mp, E), x.dtype),
        grid_spec=pltpu.PrefetchScalarGridSpec(
            num_scalar_prefetch=0,
            grid=(G, num_m),                   # g OUTER, M tiles inner
            in_specs=[
                pl.BlockSpec((1, TILE_M, K), lambda g, m: (g, m, 0)),
                pl.BlockSpec((1, K, E), lambda g, m: (g, 0, 0)),   # per-group, reused across m
                pl.BlockSpec((1, 1, E), lambda g, m: (g, 0, 0)),
            ],
            out_specs=pl.BlockSpec((1, TILE_M, E), lambda g, m: (g, m, 0)),
        ),
        compiler_params=pltpu.CompilerParams(
            dimension_semantics=("parallel", "parallel"),
            vmem_limit_bytes=vmem_limit),
    )(patches, wr, br)

    out = out[:, :M, :]                                         # drop M padding
    # (G, B*N, E) -> (B, G, N, E) -> (B, G*N, E): 'b (l c) h w -> b (l h w) c'.
    return out.reshape(G, B, N, E).transpose(1, 0, 2, 3).reshape(B, G * N, E)


def _reference(x, weight, bias, *, patch_size, bands_per_token):
    """Pure-JAX reference (grouped strided conv + rearrange)."""
    B, C, H, W = x.shape
    p = patch_size
    G = C // bands_per_token
    E = weight.shape[0] // G
    Hp, Wp = H // p, W // p
    xr = x.reshape(B, G, bands_per_token, Hp, p, Wp, p)
    patches = xr.transpose(0, 1, 3, 5, 2, 4, 6).reshape(
        B, G, Hp * Wp, bands_per_token * p * p)
    wr = weight.reshape(G, E, bands_per_token * p * p)
    out = jnp.einsum("bgnk,gek->bgne", patches, wr) + bias.reshape(G, 1, E)
    return out.reshape(B, G * Hp * Wp, E)


if __name__ == "__main__":
    # Small config: img_size=16, in_channels=4, patch_size=4, embed_dim=32,
    # bands_per_token=2 -> groups=2, seq_len = 2 * 16 = 32.
    B, C, H, W = 2, 4, 16, 16
    patch_size = 4
    embed_dim = 32
    bands_per_token = 2
    groups = C // bands_per_token

    key = jax.random.PRNGKey(0)
    kx, kw, kb = jax.random.split(key, 3)
    x = jax.random.normal(kx, (B, C, H, W), dtype=jnp.float32)
    weight = 0.02 * jax.random.normal(
        kw, (embed_dim * groups, bands_per_token, patch_size, patch_size),
        dtype=jnp.float32)
    bias = 0.01 * jax.random.normal(kb, (embed_dim * groups,), dtype=jnp.float32)

    ref = _reference(x, weight, bias, patch_size=patch_size,
                     bands_per_token=bands_per_token)

    # Default path: M (= B*N = 32) < tile_m -> single full-extent M block per group.
    out = grouped_hyperspectral_patch_embed(
        x, weight, bias, patch_size=patch_size, bands_per_token=bands_per_token)
    out = jax.block_until_ready(out)
    assert out.shape == (B, groups * (H // patch_size) * (W // patch_size), embed_dim)
    assert jnp.allclose(out, ref, atol=1e-5, rtol=1e-5)

    # Small tile override exercises the multi-tile + M-padding path.
    out2 = jax.block_until_ready(grouped_hyperspectral_patch_embed(
        x, weight, bias, patch_size=patch_size, bands_per_token=bands_per_token,
        tile_m=24))
    assert jnp.allclose(out2, ref, atol=1e-5, rtol=1e-5)

    print("KERNEL_OK")
</pallas_src>

<mosaic_0001>
module attributes {stable_mosaic.version = 11 : i64} {
  func.func @_grouped_patch_embed_kernel(%arg0: i32, %arg1: i32, %arg2: memref<1x32x32xf32, #tpu.memory_space<vmem>>, %arg3: memref<1x32x32xf32, #tpu.memory_space<vmem>>, %arg4: memref<1x1x32xf32, #tpu.memory_space<vmem>>, %arg5: memref<1x32x32xf32, #tpu.memory_space<vmem>>) attributes {dimension_semantics = [#tpu.dimension_semantics<parallel>, #tpu.dimension_semantics<parallel>], iteration_bounds = array<i64: 2, 1>, scalar_prefetch = 0 : i64, scratch_operands = 0 : i64, tpu.core_type = #tpu.core_type<tc>, window_params = [{transform_indices = @transform_0, window_bounds = array<i64: 1, 32, 32>}, {transform_indices = @transform_1, window_bounds = array<i64: 1, 32, 32>}, {transform_indices = @transform_2, window_bounds = array<i64: 1, 1, 32>}, {transform_indices = @transform_3, window_bounds = array<i64: 1, 32, 32>}]} {
    %c0 = arith.constant 0 : index
    %c0_0 = arith.constant 0 : index
    %c0_1 = arith.constant 0 : index
    %0 = vector.load %arg2[%c0, %c0_0, %c0_1] : memref<1x32x32xf32, #tpu.memory_space<vmem>>, vector<1x32x32xf32>
    %1 = vector.shape_cast %0 : vector<1x32x32xf32> to vector<32x32xf32>
    %c0_2 = arith.constant 0 : index
    %c0_3 = arith.constant 0 : index
    %c0_4 = arith.constant 0 : index
    %2 = vector.load %arg3[%c0_2, %c0_3, %c0_4] : memref<1x32x32xf32, #tpu.memory_space<vmem>>, vector<1x32x32xf32>
    %3 = vector.shape_cast %2 : vector<1x32x32xf32> to vector<32x32xf32>
    %cst = arith.constant dense<0.000000e+00> : vector<32x32xf32>
    %4 = tpu.matmul %1, %3, %cst {dimension_numbers = #tpu.dot_dimension_numbers<[1], [0], [0], [1], [0, 0, 1, 1], [], []>} : vector<32x32xf32>, vector<32x32xf32>, vector<32x32xf32> -> vector<32x32xf32>
    %c0_5 = arith.constant 0 : index
    %c0_6 = arith.constant 0 : index
    %c0_7 = arith.constant 0 : index
    %5 = vector.load %arg4[%c0_5, %c0_6, %c0_7] : memref<1x1x32xf32, #tpu.memory_space<vmem>>, vector<1x1x32xf32>
    %6 = vector.shape_cast %5 : vector<1x1x32xf32> to vector<1x32xf32>
    %7 = vector.broadcast %6 : vector<1x32xf32> to vector<32x32xf32>
    %8 = arith.addf %4, %7 : vector<32x32xf32>
    %c0_8 = arith.constant 0 : index
    %c0_9 = arith.constant 0 : index
    %c0_10 = arith.constant 0 : index
    %9 = vector.load %arg5[%c0_8, %c0_9, %c0_10] : memref<1x32x32xf32, #tpu.memory_space<vmem>>, vector<1x32x32xf32>
    %10 = vector.shape_cast %9 : vector<1x32x32xf32> to vector<32x32xf32>
    %11 = vector.shape_cast %8 : vector<32x32xf32> to vector<1x32x32xf32>
    tpu.vector_store %arg5[%c0_8, %c0_9, %c0_10], %11 {strides = array<i32>} : memref<1x32x32xf32, #tpu.memory_space<vmem>>, vector<1x32x32xf32>,
    return
  }
  func.func @transform_0(%arg0: i32, %arg1: i32) -> (i32, i32, i32) {
    %c0_i32 = arith.constant 0 : i32
    %c0_i32_0 = arith.constant 0 : i32
    return %arg0, %arg1, %c0_i32 : i32, i32, i32
  }
  func.func @transform_1(%arg0: i32, %arg1: i32) -> (i32, i32, i32) {
    %c0_i32 = arith.constant 0 : i32
    %c0_i32_0 = arith.constant 0 : i32
    %c0_i32_1 = arith.constant 0 : i32
    return %arg0, %c0_i32, %c0_i32_0 : i32, i32, i32
  }
  func.func @transform_2(%arg0: i32, %arg1: i32) -> (i32, i32, i32) {
    %c0_i32 = arith.constant 0 : i32
    %c0_i32_0 = arith.constant 0 : i32
    %c0_i32_1 = arith.constant 0 : i32
    return %arg0, %c0_i32, %c0_i32_0 : i32, i32, i32
  }
  func.func @transform_3(%arg0: i32, %arg1: i32) -> (i32, i32, i32) {
    %c0_i32 = arith.constant 0 : i32
    %c0_i32_0 = arith.constant 0 : i32
    return %arg0, %arg1, %c0_i32 : i32, i32, i32
  }
}

</mosaic_0001>

<bundles_post_ra>
// kernel: tpu_custom_call.1
= control target key start
LH: loop header
LB: loop body
LE: loop exit
PB: predicated region body
PF: predicated region fallthrough
CT: control target
= control target key end

     0   :  { %s1011_s0 = inlined_call_operand.hbm [shape: f32[2,32,32], index: 0, kind: input, shape index: {}]   ;;  %s1012_s1 = inlined_call_operand.hbm [shape: f32[2,32,32], index: 1, kind: input, shape index: {}]   ;;  %s1013_s2 = inlined_call_operand.vmem [shape: f32[2,1,32], index: 2, kind: input, shape index: {}]   ;;  %s1014_s3 = inlined_call_operand.hbm [shape: f32[2,32,32], index: 3, kind: output, shape index: {}]  }
   0x1   :  { %1015 = sst [smem:[#allocation11_spill]] %s1011_s0 }
   0x2   :  { %8 = vsyncpa [#allocation3], 0 }
   0x3   :  { %10 = vsyncpa [#allocation3 + $0x1], 0 }
   0x4   :  { %11 = vsyncpa [#allocation6], 0 }
   0x5   :  { %13 = vsyncpa [#allocation6 + $0x1], 0 }
   0x6   :  { %14 = vsyncpa [#allocation4], 0 }
   0x7   :  { %16 = vsyncpa [#allocation4 + $0x1], 0  ;;  %s812_s12 = smov 0   ;;  %s814_s13 = smov 0  }
   0x8   :  { %s816_s14 = smov 0   ;;  %s818_s15 = smov 0  }
   0x9   :  { %s820_s16 = smov 0   ;;  %s822_s17 = smov 0  }
   0xa LB: > { %s515_s18 = sadd.s32 4294967295, %s783_s17   ;;  %s516_s19 = sadd.s32 4294967294, %s783_s17   ;;  %s783_s17 = sphi %s822_s17, %s22_s17   ;;  %s779_s16 = sphi %s820_s16, %s1027_s16   ;;  %s775_s15 = sphi %s818_s15, %s1026_s15   ;;  %s771_s14 = sphi %s816_s14, %s1025_s14   ;;  %s767_s13 = sphi %s814_s13, %s1024_s13   ;;  %s763_s12 = sphi %s812_s12, %s1023_s12  }
   0xb   : > { %s34_s20 = sadd.s32 1, %s779_s16  ;;  %s43_s21 = sadd.s32 1, %s771_s14 }
   0xc   : > { %p36_p0 = scmp.ge.s32.totalorder %s34_s20, 2  ;;  %p50_p1 = scmp.ne.s32.totalorder %s771_s14, %s767_s13 }
   0xd   : > { %p51_p2 = scmp.eq.s32.totalorder %s783_s17, 0  ;;  %p56_p3 = scmp.ne.s32.totalorder %s767_s13, %s763_s12 }
   0xe   : > { %s1029_s20 = smov (%p36_p0, %s34_s20), 0  ;;  %p57_p5 = scmp.eq.s32.totalorder %s515_s18, 0 }
   0xf   : > { %p853_p4 = por %p51_p2, %p50_p1  ;;  %s38_s23 = ssub.s32 %s779_s16, %s1029_s20 }
  0x10   : > { %p134_p6 = scmp.eq.s32.totalorder %s515_s18, 1  ;;  %p41_p7 = scmp.eq.s32.totalorder %s38_s23, 0 }
  0x11   : > { %p859_p8 = por %p57_p5, %p56_p3  ;;  %p140_p10 = scmp.eq.s32.totalorder %s516_s19, 1 }
  0x12   : > { %p863_p9 = por %p134_p6, %p50_p1  ;;  %p518_p12 = scmp.ge.s32.totalorder %s783_s17, 2 }
  0x13   : > { %s868_s26 = scalar_select %p41_p7, %s771_s14, %s43_s21  }
  0x14   : > { %p870_p11 = por %p140_p10, %p56_p3  ;;  %p589_p13 = scmp.lt.s32.totalorder %s783_s17, 2 }
  0x15   : > { %s877_s28 = sand.u32 1, %s771_s14   ;;  %s539_s30 = sshll.u32 %s779_s16, 9 }
  0x16   : > { %s519_s29 = sshll.u32 %s877_s28, 5  ;;  %s1020_s0 = sld [smem:[#allocation11_spill]] }
  0x17   : > { %s164_s7 = scalar_lea.vmem [#allocation2], %s519_s29  ;;  %p890_p0 = pnand %p589_p13, %p853_p4 }
  0x18   : > { %s173_s8 = sshll.u32 %s164_s7, 4  ;;  %p525_p1 = scmp.ge.s32.totalorder %s783_s17, 1  ;;  %s174_s8 = int_to_ptr.vmem [resolvable:$true] %s173_s8 }
  0x19   : > { %s161_s10 = scalar_lea.sflag [#allocation3], %s877_s28  ;;  %p645_p2 = pneg %p890_p0 }
  0x1a   : > { %s656_s11 = scalar_lea.vmem %s174_s8, 512  ;;  %s785_s18 = smov [#allocation2]  }
  0x1b   : > { %p657_p3 = scmp.ne.s32.totalorder %s174_s8, %s656_s11  ;;  %s661_s19 = sshll.u32 %s785_s18, 4  ;;  %s662_s19 = int_to_ptr.vmem [resolvable:$false] %s661_s19 }
  0x1c   : > { %s172_s6 = scalar_lea.hbm %s1020_s0, %s539_s30  ;;  %s663_s21 = scalar_lea.vmem %s662_s19, 1024 }
  0x1d   : > { %p659_p5 = pnand %p657_p3, %p645_p2  ;;  %p664_p4 = scmp.lt.s32.totalorder %s174_s8, %s662_s19 }
  0x1e   : > { %p665_p7 = scmp.lt.s32.totalorder %s663_s21, %s656_s11 }
  0x1f   : > { %p660_p6 = pneg %p659_p5 }
  0x20   : > { %p666_p10 = por %p665_p7, %p664_p4 }
  0x22   : > { %p667_p13 = pnand %p666_p10, %p660_p6 }
  0x24   : > { %670 = shalt.err (!%p667_p13)
}
  0x25   : > { %s786_s22 = smov 128   ;;  %s787_s23 = smov 8  }
  0x26   : > { %581 = dma.hbm_to_vmem [thread:$0]  (!%p890_p0), %s172_s6, 512, %s174_s8, %s161_s10, %s786_s22, %s786_s22, %s787_s23  }
  0x27   : > { %p208_p3 = scmp.lt.s32.totalorder %s783_s17, 3  ;;  %s193_s7 = scalar_lea.hbm %s1012_s1, %s539_s30 }
  0x28   : > { %s187_s18 = scalar_lea.vmem [#allocation5], %s519_s29  ;;  %s184_s21 = scalar_lea.sflag [#allocation6], %s877_s28 }
  0x29   : > { %p911_p5 = pnand %p525_p1, %p208_p3  ;;  %s194_s19 = sshll.u32 %s187_s18, 4  ;;  %s195_s19 = int_to_ptr.vmem [resolvable:$true] %s194_s19 }
  0x2a   : > { %s684_s0 = scalar_lea.vmem %s195_s19, 512  ;;  %s788_s6 = smov [#allocation5]  }
  0x2b   : > { %p685_p6 = scmp.ne.s32.totalorder %s195_s19, %s684_s0  ;;  %s689_s8 = sshll.u32 %s788_s6, 4  ;;  %s690_s8 = int_to_ptr.vmem [resolvable:$false] %s689_s8 }
  0x2c   : > { %s691_s30 = scalar_lea.vmem %s690_s8, 1024  ;;  %p692_p10 = scmp.lt.s32.totalorder %s195_s19, %s690_s8 }
  0x2d   : > { %p687_p4 = pnand %p685_p6, %p645_p2  ;;  %p693_p1 = scmp.lt.s32.totalorder %s691_s30, %s684_s0 }
  0x2f   : > { %p688_p7 = pneg %p687_p4  ;;  %p694_p13 = por %p693_p1, %p692_p10 }
  0x31   : > { %p695_p3 = pnand %p694_p13, %p688_p7 }
  0x33   : > { %698 = shalt.err (!%p695_p3)
}
  0x34   : > { %584 = dma.hbm_to_vmem [thread:$0]  (!%p890_p0), %s193_s7, 512, %s195_s19, %s184_s21, %s786_s22, %s786_s22, %s787_s23  }
  0x35   : > { %212 = sbr.rel (%p911_p5) target bundleno = 282 (0x11a), region = 32  ;;  %s926_s28 = sand.u32 (!%p911_p5), 1, %s767_s13  }
  0x36   : > { %s929_s29 = sshll.u32 (!%p911_p5), %s926_s28, 5  ;;  %s215_s10 = scalar_lea.sflag (!%p911_p5), [#allocation3], %s926_s28 }
  0x37   : > { %s218_s0 = scalar_lea.vmem (!%p911_p5), [#allocation2], %s929_s29 }
  0x3a   : > { %750 = dma.done.wait (%p859_p8), %s215_s10, 512  }
  0x3b   : > { %752 = vsyncadd (%p859_p8), %s215_s10, 4294966784  ;;  %s224_s9 = scalar_lea.sflag [#allocation6], %s926_s28  ;;  %s227_s22 = scalar_lea.vmem [#allocation5], %s929_s29 }
  0x3c   : > { %754 = dma.done.wait (%p859_p8), %s224_s9, 512  }
  0x3d   : > { %756 = vsyncadd (%p859_p8), %s224_s9, 4294966784  ;;  %v270_v0 = vld [vmem:[%s227_s22 + $0x18] sm:$0xff]  ;;  %v269_v1 = vld [vmem:[%s227_s22 + $0x10] sm:$0xff]  ;;  %vm278_vm0 = vcmask 261120   ;;  %p259_p8 = scmp.lt.s32.totalorder %s775_s15, 1  ;;  %s257_s7 = scalar_lea.vmem [#allocation7], %s929_s29 }
  0x3e   : > { %550 = vmatprep.subr.mxu0 %v270_v0  ;;  %564 = vmatprep.subr.mxu1 %v270_v0  ;;  %v268_v2 = vld [vmem:[%s227_s22 + $0x8] sm:$0xff]  ;;  %v267_v3 = vld [vmem:[%s227_s22] sm:$0xff]  ;;  %v265_v5 = vld [vmem:[%s218_s0 + $0x10] sm:$0xff]  ;;  %s396_s11 = sshll.u32 %s257_s7, 4  ;;  %s541_s18 = sshll.u32 %s775_s15, 9  ;;  %s954_s11 = int_to_ptr.vmem [resolvable:$true] %s396_s11 }
  0x3f   : > { %551 = vmatpush3.msra.mxu0 %v270_v0  ;;  %568 = vmatpush3.msra.mxu1 %v270_v0  ;;  %v263_v4 = vld [vmem:[%s218_s0] sm:$0xff]  ;;  %v264_v6 = vld [vmem:[%s218_s0 + $0x8] sm:$0xff]  ;;  %v266_v7 = vld [vmem:[%s218_s0 + $0x18] sm:$0xff]  ;;  %s260_s24 = scalar_select %p259_p8, %s775_s15, 1 }
  0x40   : > { %552 = vmatprep.subr.mxu0 %v269_v1  ;;  %565 = vmatprep.subr.mxu1 %v269_v1  ;;  %s959_s6 = scalar_lea.hbm %s1014_s3, %s541_s18  ;;  %s381_s15 = scalar_lea.sflag [#allocation4], %s926_s28 }
  0x41   : > { %553 = vmatpush3.msra.mxu0 %v269_v1  ;;  %569 = vmatpush3.msra.mxu1 %v269_v1  ;;  %s261_s5 = scalar_lea.vmem %s1013_s2, %s260_s24  ;;  %s699_s8 = scalar_lea.vmem %s954_s11, 512 }
  0x42   : > { %554 = vmatprep.subr.mxu0 %v268_v2  ;;  %566 = vmatprep.subr.mxu1 %v268_v2  ;;  %v529_v8 = vld [vmem:[%s261_s5] ss:$0 sm:$0xff]  ;;  %p700_p0 = scmp.ne.s32.totalorder %s954_s11, %s699_s8  ;;  %s789_s30 = smov [#allocation7]  }
  0x43   : > { %555 = vmatpush3.msra.mxu0 %v268_v2  ;;  %570 = vmatpush3.msra.mxu1 %v268_v2  ;;  %s703_s29 = sshll.u32 %s789_s30, 4  ;;  %s704_s29 = int_to_ptr.vmem [resolvable:$false] %s703_s29 }
  0x44   : > { %556 = vmatprep.subr.mxu0 %v267_v3  ;;  %567 = vmatprep.subr.mxu1 %v267_v3  ;;  %p701_p2 = pnand %p700_p0, %p863_p9  ;;  %s705_s10 = scalar_lea.vmem %s704_s29, 1024 }
  0x45   : > { %557 = vmatpush3.msra.mxu0 %v267_v3  ;;  %571 = vmatpush3.msra.mxu1 %v267_v3  ;;  %p706_p6 = scmp.lt.s32.totalorder %s954_s11, %s704_s29  ;;  %p707_p4 = scmp.lt.s32.totalorder %s705_s10, %s699_s8 }
  0x46   : > { %558 = vmatprep.mubr.msk.f32.mxu0 %vm278_vm0, %v263_v4  ;;  %561 = vmatprep.mubr.msk.f32.mxu1 %vm278_vm0, %v265_v5  ;;  %p702_p5 = pneg %p701_p2 }
  0x47   : > { %559 = vmatmul.mubr.msk.f32.vlgmr.msra.gmra.mxu0 %vm278_vm0, %v264_v6  ;;  %562 = vmatmul.mubr.msk.f32.vlgmr.msra.gmra.mxu1 %vm278_vm0, %v266_v7  ;;  %p708_p7 = por %p707_p4, %p706_p6 }
  0x49   : > { %p709_p10 = pnand %p708_p7, %p702_p5 }
 0x107   : > { %v560_v9 = vpop.f32.mrf.mxu0  ;;  %v563_v10 = vpop.f32.mrf.mxu1 }
 0x108   : > { %v363_v11 = vadd.f32 %v560_v9, %v529_v8  ;;  %v373_v12 = vadd.f32 %v563_v10, %v529_v8 }
 0x109   : > { %v357_v13 = vpop.f32.mrf.mxu0  ;;  %v367_v14 = vpop.f32.mrf.mxu1 }
 0x10a   : > { %377 = vst.msk [vmem:[%s257_s7 + $0x8] sm:$0xff] %vm278_vm0, %v363_v11  ;;  %379 = vst.msk [vmem:[%s257_s7 + $0x18] sm:$0xff] %vm278_vm0, %v373_v12  ;;  %v358_v15 = vadd.f32 %v529_v8, %v357_v13  ;;  %v368_v16 = vadd.f32 %v529_v8, %v367_v14 }
 0x10c   : > { %376 = vst.msk [vmem:[%s257_s7] sm:$0xff] %vm278_vm0, %v358_v15  ;;  %378 = vst.msk [vmem:[%s257_s7 + $0x10] sm:$0xff] %vm278_vm0, %v368_v16 }
 0x10d   : > { %712 = shalt.err (!%p709_p10)
}
 0x10e   : > { %s713_s0 = scalar_lea.hbm %s959_s6, 512  ;;  %s717_s24 = scalar_lea.hbm %s1014_s3, 1024 }
 0x10f   : > { %p714_p1 = scmp.ne.s32.totalorder %s959_s6, %s713_s0  ;;  %p718_p8 = scmp.lt.s32.totalorder %s959_s6, %s1014_s3 }
 0x110   : > { %p719_p0 = scmp.lt.s32.totalorder %s717_s24, %s713_s0 }
 0x111   : > { %p715_p13 = pnand %p714_p1, %p863_p9 }
 0x112   : > { %p720_p2 = por %p719_p0, %p718_p8 }
 0x113   : > { %p716_p3 = pneg %p715_p13 }
 0x115   : > { %p721_p5 = pnand %p720_p2, %p716_p3 }
 0x117   : > { %724 = shalt.err (!%p721_p5)
}
 0x118   : > { %s790_s5 = smov 128   ;;  %s791_s7 = smov 8  }
 0x119   : > { %576 = dma.vmem_to_hbm [thread:$0]  (%p863_p9), %s954_s11, 512, %s959_s6, %s381_s15, %s790_s5, %s790_s5, %s791_s7  }
 0x11a PF: > { %s411_s18 = sand.u32 1, %s763_s12   ;;  %p586_p6 = pnand %p518_p12, %p870_p11 }
 0x11b   : > { %s412_s19 = scalar_lea.sflag [#allocation4], %s411_s18 }
 0x11c   : > { %p587_p4 = pneg %p586_p6 }
 0x11e   : > { %758 = dma.done.wait (%p587_p4), %s412_s19, 512  }
 0x11f   : > { %760 = vsyncadd (%p587_p4), %s412_s19, 4294966784  ;;  %s22_s17 = sadd.s32 1, %s783_s17   ;;  %s1023_s12 = smov %s767_s13 }
 0x120   : > { %p19_p7 = scmp.ge.s32.totalorder %s22_s17, 4   ;;  %s1024_s13 = smov %s771_s14 }
 0x121   : > { %s1025_s14 = smov %s868_s26  ;;  %s1026_s15 = smov %s779_s16 }
 0x122   : > { %s1027_s16 = smov %s1029_s20  ;;  %21 = sbr.rel (!%p19_p7) target bundleno = 10 (0xa), region = 93 }
 0x127   :  { %417 = vsyncpa [#allocation3], 1 }
 0x128   :  { %419 = vsyncpa [#allocation3 + $0x1], 1 }
 0x129   :  { %420 = vsyncpa [#allocation6], 1 }
 0x12a   :  { %422 = vsyncpa [#allocation6 + $0x1], 1 }
 0x12b   :  { %423 = vsyncpa [#allocation4], 1 }
 0x12c   :  { %425 = vsyncpa [#allocation4 + $0x1], 1 }

</bundles_post_ra>
